<compile_context>
chip_gen: v6e
topology: v6e:2x2x1
jax: 0.10.0
libtpu: 0.0.40
codegen_flags: <defaults>
</compile_context>

<pallas_src>
import functools

import jax
import jax.numpy as jnp
from jax.experimental import pallas as pl
from jax.experimental.pallas import tpu as pltpu


def _dice_sums_kernel(x_ref, y_ref, inter_ref, spred_ref, sgt_ref):
    # x_ref:     (1, C, S_tile)  predictions (any float dtype; upcast to f32 here)
    # y_ref:     (1, 1, S_tile)  int32 label map (padded positions hold -1)
    # inter_ref: (1, C, 1) f32   running sum of (x * onehot)  over spatial tiles
    # spred_ref: (1, C, 1) f32   running sum of x             over spatial tiles
    # sgt_ref:   (1, C, 1) f32   running sum of onehot        over spatial tiles
    @pl.when(pl.program_id(1) == 0)
    def _():
        inter_ref[...] = jnp.zeros_like(inter_ref)
        spred_ref[...] = jnp.zeros_like(spred_ref)
        sgt_ref[...] = jnp.zeros_like(sgt_ref)

    x = x_ref[0].astype(jnp.float32)            # (C, S_tile), f32 accumulation
    y = y_ref[0]                                # (1, S_tile) int32

    C, S_tile = x.shape
    chan = jax.lax.broadcasted_iota(jnp.int32, (C, S_tile), 0)
    # equivalent of y_onehot.scatter_(1, gt, 1): padded labels (-1) match no channel
    onehot = (chan == y).astype(jnp.float32)    # (C, S_tile)

    inter_ref[...] += jnp.sum(x * onehot, axis=-1, keepdims=True)[None]   # (1, C, 1)
    spred_ref[...] += jnp.sum(x, axis=-1, keepdims=True)[None]
    sgt_ref[...] += jnp.sum(onehot, axis=-1, keepdims=True)[None]


def part_soft_dice_loss(x, y_labels, smooth=1.0):
    """Forward of PartMemoryEfficientSoftDiceLoss with default hyperparameters.

    x:        (B, C, H, W) float predictions (f32 or bf16; bf16 halves HBM traffic)
    y_labels: (B, H, W) integer label map (the len(shp_x) != len(shp_y) branch).
    """
    # TODO(synk): ddp AllGatherGrad branch (only active with batch_dice=True on
    # multi-process runs) and loss_mask are not reproduced here.
    B, C, H, W = x.shape
    S = H * W

    x_flat = x.reshape(B, C, S)                           # lane-dense spatial axis
    y_flat = y_labels.reshape(B, 1, S).astype(jnp.int32)

    # Spatial tile: multiple of 128, capped at ~4 MiB of f32 per x block so that
    # double-buffered inputs stay far below every generation's VMEM limit.
    LANE = 128
    target_bytes = 4 * 1024 * 1024
    cap = max(LANE, (target_bytes // (4 * C)) // LANE * LANE)
    s_tile = min(pl.cdiv(S, LANE) * LANE, cap)
    S_pad = pl.cdiv(S, s_tile) * s_tile
    if S_pad != S:
        # pad x with 0 (no effect on sums) and labels with -1 (matches no channel)
        x_flat = jnp.pad(x_flat, ((0, 0), (0, 0), (0, S_pad - S)))
        y_flat = jnp.pad(y_flat, ((0, 0), (0, 0), (0, S_pad - S)),
                         constant_values=-1)
    n_s = S_pad // s_tile

    sum_spec = pl.BlockSpec((1, C, 1), lambda b, s: (b, 0, 0))
    intersect, sum_pred, sum_gt = pl.pallas_call(
        _dice_sums_kernel,
        out_shape=(
            jax.ShapeDtypeStruct((B, C, 1), jnp.float32),
            jax.ShapeDtypeStruct((B, C, 1), jnp.float32),
            jax.ShapeDtypeStruct((B, C, 1), jnp.float32),
        ),
        grid_spec=pltpu.PrefetchScalarGridSpec(
            num_scalar_prefetch=0,
            grid=(B, n_s),
            in_specs=[
                pl.BlockSpec((1, C, s_tile), lambda b, s: (b, 0, s)),
                pl.BlockSpec((1, 1, s_tile), lambda b, s: (b, 0, s)),
            ],
            out_specs=(sum_spec, sum_spec, sum_spec),
        ),
        compiler_params=pltpu.CompilerParams(
            dimension_semantics=("parallel", "arbitrary")),
    )(x_flat, y_flat)

    intersect = intersect[..., 0]                         # (B, C)
    sum_pred = sum_pred[..., 0]
    sum_gt = sum_gt[..., 0]

    dc = (2.0 * intersect + smooth) / jnp.clip(sum_gt + sum_pred + smooth, 1e-8)
    return -jnp.mean(dc)                                  # batch_dice=False path


def reference_loss(x, y_labels, smooth=1.0):
    """Pure-JAX reference matching the PyTorch forward (default config)."""
    B, C, H, W = x.shape
    y_onehot = jax.nn.one_hot(y_labels, C, axis=1, dtype=jnp.float32)   # (B, C, H, W)
    axes = (2, 3)
    xf = x.astype(jnp.float32)
    intersect = jnp.sum(xf * y_onehot, axes)
    sum_pred = jnp.sum(xf, axes)
    sum_gt = jnp.sum(y_onehot, axes)
    dc = (2.0 * intersect + smooth) / jnp.clip(sum_gt + sum_pred + smooth, 1e-8)
    return -jnp.mean(dc)


if __name__ == "__main__":
    B, C, H, W = 2, 4, 16, 16
    key = jax.random.PRNGKey(0)
    kx, ky = jax.random.split(key)
    # Typical usage feeds softmax-ed logits; module default apply_nonlin=None just
    # consumes x as-is, which is exactly what the kernel does.
    x = jax.nn.softmax(jax.random.normal(kx, (B, C, H, W), jnp.float32), axis=1)
    y = jax.random.randint(ky, (B, H, W), 0, C, dtype=jnp.int32)

    loss = part_soft_dice_loss(x, y)
    loss = jax.block_until_ready(loss)

    ref = reference_loss(x, y)
    assert jnp.allclose(loss, ref, atol=1e-5, rtol=1e-5), (loss, ref)
    print("KERNEL_OK")
</pallas_src>

<mosaic_0001>
module attributes {stable_mosaic.version = 11 : i64} {
  func.func @_dice_sums_kernel(%arg0: i32, %arg1: i32, %arg2: memref<1x4x256xf32, #tpu.memory_space<vmem>>, %arg3: memref<1x1x256xi32, #tpu.memory_space<vmem>>, %arg4: memref<1x4x1xf32, #tpu.memory_space<vmem>>, %arg5: memref<1x4x1xf32, #tpu.memory_space<vmem>>, %arg6: memref<1x4x1xf32, #tpu.memory_space<vmem>>) attributes {dimension_semantics = [#tpu.dimension_semantics<parallel>, #tpu.dimension_semantics<arbitrary>], iteration_bounds = array<i64: 2, 1>, scalar_prefetch = 0 : i64, scratch_operands = 0 : i64, tpu.core_type = #tpu.core_type<tc>, window_params = [{transform_indices = @transform_0, window_bounds = array<i64: 1, 4, 256>}, {transform_indices = @transform_1, window_bounds = array<i64: 1, 1, 256>}, {transform_indices = @transform_2, window_bounds = array<i64: 1, 4, 1>}, {transform_indices = @transform_3, window_bounds = array<i64: 1, 4, 1>}, {transform_indices = @transform_4, window_bounds = array<i64: 1, 4, 1>}]} {
    %c0_i32 = arith.constant 0 : i32
    %0 = arith.cmpi eq, %arg1, %c0_i32 : i32
    %1 = arith.extui %0 : i1 to i32
    %c0_i32_0 = arith.constant 0 : i32
    %2 = arith.cmpi ne, %1, %c0_i32_0 : i32
    scf.if %2 {
      %cst_26 = arith.constant 0.000000e+00 : f32
      %31 = vector.broadcast %cst_26 : f32 to vector<1x4x1xf32>
      %c0_27 = arith.constant 0 : index
      %c0_28 = arith.constant 0 : index
      %c0_29 = arith.constant 0 : index
      %32 = vector.load %arg4[%c0_27, %c0_28, %c0_29] : memref<1x4x1xf32, #tpu.memory_space<vmem>>, vector<1x4x1xf32>
      tpu.vector_store %arg4[%c0_27, %c0_28, %c0_29], %31 {strides = array<i32>} : memref<1x4x1xf32, #tpu.memory_space<vmem>>, vector<1x4x1xf32>,
      %cst_30 = arith.constant 0.000000e+00 : f32
      %33 = vector.broadcast %cst_30 : f32 to vector<1x4x1xf32>
      %c0_31 = arith.constant 0 : index
      %c0_32 = arith.constant 0 : index
      %c0_33 = arith.constant 0 : index
      %34 = vector.load %arg5[%c0_31, %c0_32, %c0_33] : memref<1x4x1xf32, #tpu.memory_space<vmem>>, vector<1x4x1xf32>
      tpu.vector_store %arg5[%c0_31, %c0_32, %c0_33], %33 {strides = array<i32>} : memref<1x4x1xf32, #tpu.memory_space<vmem>>, vector<1x4x1xf32>,
      %cst_34 = arith.constant 0.000000e+00 : f32
      %35 = vector.broadcast %cst_34 : f32 to vector<1x4x1xf32>
      %c0_35 = arith.constant 0 : index
      %c0_36 = arith.constant 0 : index
      %c0_37 = arith.constant 0 : index
      %36 = vector.load %arg6[%c0_35, %c0_36, %c0_37] : memref<1x4x1xf32, #tpu.memory_space<vmem>>, vector<1x4x1xf32>
      tpu.vector_store %arg6[%c0_35, %c0_36, %c0_37], %35 {strides = array<i32>} : memref<1x4x1xf32, #tpu.memory_space<vmem>>, vector<1x4x1xf32>,
    } else {
    }
    %c0 = arith.constant 0 : index
    %c0_1 = arith.constant 0 : index
    %c0_2 = arith.constant 0 : index
    %3 = vector.load %arg2[%c0, %c0_1, %c0_2] : memref<1x4x256xf32, #tpu.memory_space<vmem>>, vector<1x4x256xf32>
    %4 = vector.shape_cast %3 : vector<1x4x256xf32> to vector<4x256xf32>
    %c0_3 = arith.constant 0 : index
    %c0_4 = arith.constant 0 : index
    %c0_5 = arith.constant 0 : index
    %5 = vector.load %arg3[%c0_3, %c0_4, %c0_5] : memref<1x1x256xi32, #tpu.memory_space<vmem>>, vector<1x1x256xi32>
    %6 = vector.shape_cast %5 : vector<1x1x256xi32> to vector<1x256xi32>
    %7 = tpu.iota {dimensions = array<i32: 0>} : vector<4x256xi32>
    %8 = vector.broadcast %6 : vector<1x256xi32> to vector<4x256xi32>
    %9 = arith.cmpi eq, %7, %8 : vector<4x256xi32>
    %10 = arith.extui %9 : vector<4x256xi1> to vector<4x256xi32>
    %11 = arith.sitofp %10 : vector<4x256xi32> to vector<4x256xf32>
    %c0_6 = arith.constant 0 : index
    %c0_7 = arith.constant 0 : index
    %c0_8 = arith.constant 0 : index
    %12 = vector.load %arg4[%c0_6, %c0_7, %c0_8] : memref<1x4x1xf32, #tpu.memory_space<vmem>>, vector<1x4x1xf32>
    %13 = arith.mulf %4, %11 : vector<4x256xf32>
    %cst = arith.constant dense<0.000000e+00> : vector<4xf32>
    %14 = vector.multi_reduction <add>, %13, %cst [1] : vector<4x256xf32> to vector<4xf32>
    %15 = vector.shape_cast %14 : vector<4xf32> to vector<4x1xf32>
    %16 = vector.shape_cast %15 : vector<4x1xf32> to vector<1x4x1xf32>
    %17 = arith.addf %12, %16 : vector<1x4x1xf32>
    %c0_9 = arith.constant 0 : index
    %c0_10 = arith.constant 0 : index
    %c0_11 = arith.constant 0 : index
    %18 = vector.load %arg4[%c0_9, %c0_10, %c0_11] : memref<1x4x1xf32, #tpu.memory_space<vmem>>, vector<1x4x1xf32>
    tpu.vector_store %arg4[%c0_9, %c0_10, %c0_11], %17 {strides = array<i32>} : memref<1x4x1xf32, #tpu.memory_space<vmem>>, vector<1x4x1xf32>,
    %c0_12 = arith.constant 0 : index
    %c0_13 = arith.constant 0 : index
    %c0_14 = arith.constant 0 : index
    %19 = vector.load %arg5[%c0_12, %c0_13, %c0_14] : memref<1x4x1xf32, #tpu.memory_space<vmem>>, vector<1x4x1xf32>
    %cst_15 = arith.constant dense<0.000000e+00> : vector<4xf32>
    %20 = vector.multi_reduction <add>, %4, %cst_15 [1] : vector<4x256xf32> to vector<4xf32>
    %21 = vector.shape_cast %20 : vector<4xf32> to vector<4x1xf32>
    %22 = vector.shape_cast %21 : vector<4x1xf32> to vector<1x4x1xf32>
    %23 = arith.addf %19, %22 : vector<1x4x1xf32>
    %c0_16 = arith.constant 0 : index
    %c0_17 = arith.constant 0 : index
    %c0_18 = arith.constant 0 : index
    %24 = vector.load %arg5[%c0_16, %c0_17, %c0_18] : memref<1x4x1xf32, #tpu.memory_space<vmem>>, vector<1x4x1xf32>
    tpu.vector_store %arg5[%c0_16, %c0_17, %c0_18], %23 {strides = array<i32>} : memref<1x4x1xf32, #tpu.memory_space<vmem>>, vector<1x4x1xf32>,
    %c0_19 = arith.constant 0 : index
    %c0_20 = arith.constant 0 : index
    %c0_21 = arith.constant 0 : index
    %25 = vector.load %arg6[%c0_19, %c0_20, %c0_21] : memref<1x4x1xf32, #tpu.memory_space<vmem>>, vector<1x4x1xf32>
    %cst_22 = arith.constant dense<0.000000e+00> : vector<4xf32>
    %26 = vector.multi_reduction <add>, %11, %cst_22 [1] : vector<4x256xf32> to vector<4xf32>
    %27 = vector.shape_cast %26 : vector<4xf32> to vector<4x1xf32>
    %28 = vector.shape_cast %27 : vector<4x1xf32> to vector<1x4x1xf32>
    %29 = arith.addf %25, %28 : vector<1x4x1xf32>
    %c0_23 = arith.constant 0 : index
    %c0_24 = arith.constant 0 : index
    %c0_25 = arith.constant 0 : index
    %30 = vector.load %arg6[%c0_23, %c0_24, %c0_25] : memref<1x4x1xf32, #tpu.memory_space<vmem>>, vector<1x4x1xf32>
    tpu.vector_store %arg6[%c0_23, %c0_24, %c0_25], %29 {strides = array<i32>} : memref<1x4x1xf32, #tpu.memory_space<vmem>>, vector<1x4x1xf32>,
    return
  }
  func.func @transform_0(%arg0: i32, %arg1: i32) -> (i32, i32, i32) {
    %c0_i32 = arith.constant 0 : i32
    %c0_i32_0 = arith.constant 0 : i32
    return %arg0, %c0_i32, %arg1 : i32, i32, i32
  }
  func.func @transform_1(%arg0: i32, %arg1: i32) -> (i32, i32, i32) {
    %c0_i32 = arith.constant 0 : i32
    %c0_i32_0 = arith.constant 0 : i32
    return %arg0, %c0_i32, %arg1 : i32, i32, i32
  }
  func.func @transform_2(%arg0: i32, %arg1: i32) -> (i32, i32, i32) {
    %c0_i32 = arith.constant 0 : i32
    %c0_i32_0 = arith.constant 0 : i32
    %c0_i32_1 = arith.constant 0 : i32
    return %arg0, %c0_i32, %c0_i32_0 : i32, i32, i32
  }
  func.func @transform_3(%arg0: i32, %arg1: i32) -> (i32, i32, i32) {
    %c0_i32 = arith.constant 0 : i32
    %c0_i32_0 = arith.constant 0 : i32
    %c0_i32_1 = arith.constant 0 : i32
    return %arg0, %c0_i32, %c0_i32_0 : i32, i32, i32
  }
  func.func @transform_4(%arg0: i32, %arg1: i32) -> (i32, i32, i32) {
    %c0_i32 = arith.constant 0 : i32
    %c0_i32_0 = arith.constant 0 : i32
    %c0_i32_1 = arith.constant 0 : i32
    return %arg0, %c0_i32, %c0_i32_0 : i32, i32, i32
  }
}

</mosaic_0001>

<bundles_post_ra>
// kernel: tpu_custom_call.1
= control target key start
LH: loop header
LB: loop body
LE: loop exit
PB: predicated region body
PF: predicated region fallthrough
CT: control target
= control target key end

     0   :  { %10 = vsyncpa [#allocation3], 0  ;;  %s896_s0 = inlined_call_operand.hbm [shape: f32[2,4,256], index: 0, kind: input, shape index: {}]   ;;  %s897_s1 = inlined_call_operand.hbm [shape: s32[2,1,256], index: 1, kind: input, shape index: {}]   ;;  %s898_s2 = inlined_call_operand.vmem [shape: f32[2,4,1], index: 2, kind: output, shape index: {0}]   ;;  %s899_s3 = inlined_call_operand.vmem [shape: f32[2,4,1], index: 3, kind: output, shape index: {1}]   ;;  %s900_s4 = inlined_call_operand.vmem [shape: f32[2,4,1], index: 4, kind: output, shape index: {2}]  }
   0x1   :  { %12 = vsyncpa [#allocation3 + $0x1], 0 }
   0x2   :  { %13 = vsyncpa [#allocation5], 0 }
   0x3   :  { %15 = vsyncpa [#allocation5 + $0x1], 0  ;;  %s746_s15 = smov 0   ;;  %s748_s16 = smov 0  }
   0x4   :  { %s750_s17 = smov 0   ;;  %s752_s18 = smov 0  }
   0x5   :  { %s754_s19 = smov 0   ;;  %s756_s20 = smov 0  }
   0x6 LB: > { %s522_s21 = sadd.s32 4294967295, %s716_s20   ;;  %s33_s22 = sadd.s32 1, %s712_s19  ;;  %s716_s20 = sphi %s756_s20, %s21_s20   ;;  %s712_s19 = sphi %s754_s19, %s909_s19   ;;  %s708_s18 = sphi %s752_s18, %s908_s18   ;;  %s704_s17 = sphi %s750_s17, %s907_s17   ;;  %s700_s16 = sphi %s748_s16, %s906_s16   ;;  %s696_s15 = sphi %s746_s15, %s905_s15  }
   0x7   : > { %p35_p0 = scmp.ge.s32.totalorder %s33_s22, 2  ;;  %s42_s23 = sadd.s32 1, %s704_s17 }
   0x8   : > { %p49_p1 = scmp.ne.s32.totalorder %s704_s17, %s700_s16  ;;  %p50_p2 = scmp.eq.s32.totalorder %s716_s20, 0 }
   0x9   : > { %s911_s22 = smov (%p35_p0, %s33_s22), 0  ;;  %p55_p4 = scmp.ne.s32.totalorder %s700_s16, %s696_s15 }
   0xa   : > { %p782_p3 = por %p50_p2, %p49_p1  ;;  %s37_s25 = ssub.s32 %s712_s19, %s911_s22 }
   0xb   : > { %p56_p5 = scmp.eq.s32.totalorder %s522_s21, 0  ;;  %p40_p6 = scmp.eq.s32.totalorder %s37_s25, 0 }
   0xc   : > { %p555_p8 = scmp.lt.s32.totalorder %s716_s20, 2  ;;  %s798_s28 = sand.u32 1, %s704_s17  }
   0xd   : > { %p789_p7 = por %p56_p5, %p55_p4  ;;  %s542_s29 = sshll.u32 %s712_s19, 7 }
   0xe   : > { %s795_s27 = scalar_select %p40_p6, %s704_s17, %s42_s23  }
   0xf   : > { %s526_s30 = sshll.u32 %s798_s28, 3  ;;  %s197_s7 = scalar_lea.hbm %s896_s0, %s542_s29 }
  0x10   : > { %s189_s8 = scalar_lea.vmem [#allocation2], %s526_s30  ;;  %p807_p9 = pnand %p555_p8, %p782_p3 }
  0x11   : > { %s199_s9 = sshll.u32 %s189_s8, 4  ;;  %p532_p10 = scmp.ge.s32.totalorder %s716_s20, 1  ;;  %s200_s9 = int_to_ptr.vmem [resolvable:$true] %s199_s9 }
  0x12   : > { %p225_p11 = scmp.lt.s32.totalorder %s716_s20, 3  ;;  %s186_s11 = scalar_lea.sflag [#allocation3], %s798_s28 }
  0x13   : > { %p608_p12 = pneg %p807_p9  ;;  %s619_s12 = scalar_lea.vmem %s200_s9, 128 }
  0x14   : > { %p620_p13 = scmp.ne.s32.totalorder %s200_s9, %s619_s12  ;;  %s718_s13 = smov [#allocation2]  }
  0x15   : > { %s624_s14 = sshll.u32 %s718_s13, 4  ;;  %s625_s14 = int_to_ptr.vmem [resolvable:$false] %s624_s14 }
  0x16   : > { %p622_p0 = pnand %p620_p13, %p608_p12  ;;  %s626_s15 = scalar_lea.vmem %s625_s14, 256 }
  0x17   : > { %p627_p2 = scmp.lt.s32.totalorder %s200_s9, %s625_s14  ;;  %p628_p3 = scmp.lt.s32.totalorder %s626_s15, %s619_s12 }
  0x18   : > { %p623_p1 = pneg %p622_p0 }
  0x19   : > { %p629_p4 = por %p628_p3, %p627_p2 }
  0x1b   : > { %p630_p5 = pnand %p629_p4, %p623_p1 }
  0x1d   : > { %633 = shalt.err (!%p630_p5)
}
  0x1e   : > { %551 = dma.hbm_to_vmem [thread:$0]  (!%p807_p9), %s197_s7, 128, %s200_s9, %s186_s11  }
  0x1f   : > { %p825_p6 = pnand %p532_p10, %p225_p11  ;;  %s529_s23 = sshll.u32 %s798_s28, 1 }
  0x20   : > { %s543_s24 = sshll.u32 %s712_s19, 5  ;;  %s210_s5 = scalar_lea.vmem [#allocation4], %s529_s23 }
  0x21   : > { %s218_s30 = scalar_lea.hbm %s897_s1, %s543_s24  ;;  %s220_s6 = sshll.u32 %s210_s5, 4  ;;  %s221_s6 = int_to_ptr.vmem [resolvable:$true] %s220_s6 }
  0x22   : > { %s207_s8 = scalar_lea.sflag [#allocation5], %s798_s28  ;;  %s647_s12 = scalar_lea.vmem %s221_s6, 32 }
  0x23   : > { %p648_p8 = scmp.ne.s32.totalorder %s221_s6, %s647_s12  ;;  %s719_s7 = smov [#allocation4]  }
  0x24   : > { %s652_s9 = sshll.u32 %s719_s7, 4  ;;  %s653_s9 = int_to_ptr.vmem [resolvable:$false] %s652_s9 }
  0x25   : > { %p650_p13 = pnand %p648_p8, %p608_p12  ;;  %s654_s11 = scalar_lea.vmem %s653_s9, 64 }
  0x26   : > { %p655_p10 = scmp.lt.s32.totalorder %s221_s6, %s653_s9  ;;  %p656_p11 = scmp.lt.s32.totalorder %s654_s11, %s647_s12 }
  0x27   : > { %p651_p0 = pneg %p650_p13 }
  0x28   : > { %p657_p1 = por %p656_p11, %p655_p10 }
  0x2a   : > { %p658_p2 = pnand %p657_p1, %p651_p0 }
  0x2c   : > { %661 = shalt.err (!%p658_p2)
}
  0x2d   : > { %554 = dma.hbm_to_vmem [thread:$0]  (!%p807_p9), %s218_s30, 32, %s221_s6, %s207_s8  }
  0x2e   : > { %229 = sbr.rel (%p825_p6) target bundleno = 219 (0xdb), region = 28  ;;  %s231_s28 = sand.u32 (!%p825_p6), 1, %s700_s16  }
  0x2f   : > { %s533_s13 = sshll.u32 (!%p825_p6), %s231_s28, 3  ;;  %s232_s14 = scalar_lea.sflag (!%p825_p6), [#allocation3], %s231_s28 }
  0x30   : > { %s235_s15 = scalar_lea.vmem (!%p825_p6), [#allocation2], %s533_s13 }
  0x33   : > { %687 = dma.done.wait (%p789_p7), %s232_s14, 128  }
  0x34   : > { %689 = vsyncadd (%p789_p7), %s232_s14, 4294967168  ;;  %s534_s23 = sshll.u32 %s231_s28, 1  ;;  %s241_s24 = scalar_lea.sflag [#allocation5], %s231_s28 }
  0x35   : > { %s244_s25 = scalar_lea.vmem [#allocation4], %s534_s23 }
  0x36   : > { %691 = dma.done.wait (%p789_p7), %s241_s24, 32  }
  0x37   : > { %693 = vsyncadd (%p789_p7), %s241_s24, 4294967264  ;;  %v305_v0 = vlaneseq  ;;  %p283_p9 = scmp.lt.s32.totalorder %s708_s18, 1  ;;  %vm299_vm0 = vcmask 3072   ;;  %v720_v4 = vmov 0.0   ;;  %v304_v5 = vld [vmem:[%s244_s25] sm:$0x3] }
  0x38   : > { %v303_v8 = vld [vmem:[%s235_s15] sm:$0xff]  ;;  %vm330_vm3 = vcmask 1043456  }
  0x39   : > { %v306_v1 = vshrl.u32 %v305_v0, 7  ;;  %s913_s18 = smov (!%p283_p9, %s708_s18), 1  ;;  %v341_v16 = vcombine.high %v303_v8, %v303_v8  ;;  %v343_v20 = vsel %vm330_vm3, %v303_v8, 0.0 }
  0x3a   : > { %s853_s10 = sshll.u32 %s913_s18, 2 }
  0x3b   : > { %v309_v2 = vsub.s32 0, %v306_v1  ;;  %v313_v3 = vsub.s32 1, %v306_v1  ;;  %s859_s30 = scalar_lea.vmem %s898_s2, %s853_s10  ;;  %v344_v21 = vsel %vm330_vm3, %v341_v16, 0.0  ;;  %s294_s5 = scalar_lea.vmem %s900_s4, %s853_s10 }
  0x3c   : > { %300 = vst.msk [vmem:[%s859_s30] sm:$0xf] %vm299_vm0, %v720_v4  ;;  %v345_v23 = vadd.f32 %v344_v21, %v343_v20  ;;  %s290_s12 = scalar_lea.vmem %s899_s3, %s853_s10  ;;  %302 = vst.msk [vmem:[%s294_s5] sm:$0xf] %vm299_vm0, %v720_v4 }
  0x3d   : > { %v310_v6 = vrot.slane %v304_v5, %v309_v2  ;;  %v314_v7 = vrot.slane %v304_v5, %v313_v3  ;;  %301 = vst.msk [vmem:[%s290_s12] sm:$0xf] %vm299_vm0, %v720_v4 }
  0x3f   : > { %vm315_vm1 = vcmp.eq.s32.totalorder %v306_v1, %v310_v6  ;;  %vm316_vm2 = vcmp.eq.s32.totalorder %v306_v1, %v314_v7 }
  0x40   : > { %v538_v9 = vsel %vm315_vm1, 1.0, %v720_v4  ;;  %v539_v10 = vsel %vm316_vm2, 1.0, %v720_v4 }
  0x41   : > { %v324_v11 = vcombine.low %v538_v9, %v539_v10  ;;  %v351_v12 = vsel %vm330_vm3, %v538_v9, 0.0  ;;  %v352_v13 = vsel %vm330_vm3, %v539_v10, 0.0 }
  0x42   : > { %v353_v14 = vadd.f32 %v352_v13, %v351_v12 }
  0x43   : > { %v326_v15 = vmul.f32 %v324_v11, %v303_v8  ;;  %v350_v24 = vld [vmem:[%s294_s5] sm:$0xf] }
  0x44   : > { %354 = vadd.xlane.f32.xlu1 %v353_v14  ;;  %v321_v27 = vld [vmem:[%s859_s30] sm:$0xf] }
  0x45   : > { %v328_v17 = vcombine.high %v326_v15, %v326_v15  ;;  %v331_v18 = vsel %vm330_vm3, %v326_v15, 0.0  ;;  %v339_v30 = vld [vmem:[%s290_s12] sm:$0xf] }
  0x47   : > { %v332_v19 = vsel %vm330_vm3, %v328_v17, 0.0 }
  0x48   : > { %v333_v22 = vadd.f32 %v332_v19, %v331_v18 }
  0x4a   : > { %334 = vadd.xlane.f32.xlu0 %v333_v22 }
  0x4e   : > { %346 = vadd.xlane.f32.xlu0 %v345_v23 }
  0xcd   : > { %v355_v25 = vpop.xlane.xlu1 %354 }
  0xce   : > { %v356_v26 = vadd.f32 %v355_v25, %v350_v24 }
  0xd0   : > { %357 = vst.msk [vmem:[%s294_s5] sm:$0xf] %vm299_vm0, %v356_v26 }
  0xd3   : > { %v335_v28 = vpop.xlane.xlu0 %334 }
  0xd4   : > { %v336_v29 = vadd.f32 %v335_v28, %v321_v27 }
  0xd6   : > { %338 = vst.msk [vmem:[%s859_s30] sm:$0xf] %vm299_vm0, %v336_v29 }
  0xd7   : > { %v347_v31 = vpop.xlane.xlu0 %346 }
  0xd8   : > { %v348_v32 = vadd.f32 %v347_v31, %v339_v30 }
  0xda   : > { %349 = vst.msk [vmem:[%s290_s12] sm:$0xf] %vm299_vm0, %v348_v32 }
  0xdb PF: > { %s21_s20 = sadd.s32 1, %s716_s20   ;;  %s905_s15 = smov %s700_s16 }
  0xdc   : > { %p18_p7 = scmp.ge.s32.totalorder %s21_s20, 4   ;;  %s906_s16 = smov %s704_s17 }
  0xdd   : > { %s907_s17 = smov %s795_s27  ;;  %s908_s18 = smov %s712_s19 }
  0xde   : > { %s909_s19 = smov %s911_s22  ;;  %20 = sbr.rel (!%p18_p7) target bundleno = 6 (0x6), region = 109 }
  0xe3   :  { %405 = vsyncpa [#allocation3], 1 }
  0xe4   :  { %407 = vsyncpa [#allocation3 + $0x1], 1 }
  0xe5   :  { %408 = vsyncpa [#allocation5], 1 }
  0xe6   :  { %410 = vsyncpa [#allocation5 + $0x1], 1 }

</bundles_post_ra>
